<compile_context>
chip_gen: v5e
topology: v5e:2x2
jax: 0.10.0
libtpu: 0.0.40
codegen_flags: <defaults>
</compile_context>

<pallas_src>
import functools

import jax
import jax.numpy as jnp
from jax import lax
from jax.experimental import pallas as pl
from jax.experimental.pallas import tpu as pltpu


_VMEM_TILE_BUDGET = 32 * 1024 * 1024   # target for the double-buffered working set
_VMEM_LIMIT_BYTES = 48 * 1024 * 1024   # scoped-VMEM limit (safe on v5e/v6e/v7x)


def _inverted_embed_kernel(x_ref, w_ref, b_ref, o_ref, *, tb):
    # x_ref: (TB, L, TV)  native [B, L, V] slab (variates on the lane axis)
    # w_ref: (L, D)       W^T of nn.Linear(c_in=L, d_model=D), VMEM-resident
    # b_ref: (1, D)       bias (f32), VMEM-resident
    # o_ref: (TB, TV, D)  final output slab
    w = w_ref[...]
    bias = b_ref[...]
    for b in range(tb):  # static unroll over folded batch rows
        # Contract over L with the lhs consumed transposed -> (TV, D); f32 MXU
        # accumulate.  Any XLU transpose this implies is hidden under the HBM
        # pipeline -- the op is firmly memory-bound.
        acc = lax.dot_general(
            x_ref[b], w,
            dimension_numbers=(((0,), (0,)), ((), ())),
            preferred_element_type=jnp.float32,
        )
        o_ref[b] = (acc + bias).astype(o_ref.dtype)


def _select_tiles(B, L, V, D, in_itemsize, out_itemsize, w_itemsize):
    """Pick (TB, TV) so the double-buffered working set stays under budget."""
    resident = L * D * w_itemsize + 8 * D * 4  # resident weight + (padded) bias

    def footprint(tb, tv):
        return (2 * tb * L * tv * in_itemsize        # double-buffered input slab
                + 2 * tb * tv * D * out_itemsize     # double-buffered output slab
                + resident)

    # Variate (lane) tile: full extent when small (legal even if not a multiple of
    # 128), else the largest 128-multiple fitting the budget (big DMAs -> roofline).
    if V <= 128:
        tv = V
    elif V <= 1024 and footprint(1, V) <= _VMEM_TILE_BUDGET:
        tv = V
    else:
        tv = 128
        for cand in (2048, 1024, 512, 256, 128):
            if cand <= V and footprint(1, cand) <= _VMEM_TILE_BUDGET:
                tv = cand
                break
    nv = pl.cdiv(V, tv)

    # Batch folding: with few variates each grid step is tiny (per-step overhead
    # dominates); fold TB batch rows per step.  TB must divide B (full blocks only);
    # keep the grid at >= 2 steps when possible so both v7x TensorCores get work.
    min_steps = min(2, B * nv)
    tb = 1
    for d in range(1, min(B, 32) + 1):
        if B % d != 0:
            continue
        if footprint(d, tv) > _VMEM_TILE_BUDGET:
            break
        if (B // d) * nv >= min_steps:
            tb = d
    return tb, tv


def inverted_value_embedding(x_blv, weight_t, bias_row, *, out_dtype=jnp.float32):
    """x_blv: [B, L, V] (native layout), weight_t: [L, D], bias_row: [1, D] -> [B, V, D]."""
    B, L, V = x_blv.shape
    Lw, D = weight_t.shape
    assert Lw == L, (Lw, L)

    in_b = jnp.dtype(x_blv.dtype).itemsize
    out_b = jnp.dtype(out_dtype).itemsize
    w_b = jnp.dtype(weight_t.dtype).itemsize
    tb, tv = _select_tiles(B, L, V, D, in_b, out_b, w_b)
    nb = B // tb
    nv = pl.cdiv(V, tv)

    cost = pl.CostEstimate(
        flops=2 * B * V * L * D,
        transcendentals=0,
        bytes_accessed=(B * L * V * in_b + L * D * w_b + D * 4 + B * V * D * out_b),
    )

    kernel = functools.partial(_inverted_embed_kernel, tb=tb)

    return pl.pallas_call(
        kernel,
        out_shape=jax.ShapeDtypeStruct((B, V, D), out_dtype),
        grid_spec=pltpu.PrefetchScalarGridSpec(
            num_scalar_prefetch=0,
            grid=(nb, nv),
            in_specs=[
                pl.BlockSpec((tb, L, tv), lambda ib, jv: (ib, 0, jv)),  # activation slab
                pl.BlockSpec((L, D), lambda ib, jv: (0, 0)),            # W^T, resident
                pl.BlockSpec((1, D), lambda ib, jv: (0, 0)),            # bias, resident
            ],
            out_specs=pl.BlockSpec((tb, tv, D), lambda ib, jv: (ib, jv, 0)),
        ),
        compiler_params=pltpu.CompilerParams(
            dimension_semantics=("parallel", "parallel"),
            vmem_limit_bytes=_VMEM_LIMIT_BYTES,
        ),
        cost_estimate=cost,
    )(x_blv, weight_t, bias_row)


def data_embedding_inverted(x, x_mark, weight, bias, *, out_dtype=jnp.float32):
    """Mirrors DataEmbedding_inverted.forward in eval mode (dropout = identity).

    x:      [B, L, N]
    x_mark: [B, L, M] or None
    weight: [D, L]   (nn.Linear weight, c_in=L, d_model=D)
    bias:   [D]
    returns [B, N(+M), D] in out_dtype (default float32)
    """
    D, L = weight.shape

    # Single fused call: concatenate the raw inputs along the (small) variate axis
    # in their native [B, L, V] layout -- a cheap copy -- so the kernel writes the
    # final [B, N+M, D] output directly (no output concat / extra HBM pass).
    if x_mark is not None:
        x_all = jnp.concatenate([x, x_mark.astype(x.dtype)], axis=-1)
    else:
        x_all = x

    # Do NOT pre-cast activations in the wrapper (extra HBM pass); consume the
    # producer's dtype.  Weight/bias casts are tiny one-time ops.
    weight_t = jnp.transpose(weight, (1, 0)).astype(x_all.dtype)   # [L, D]
    bias_row = bias.astype(jnp.float32).reshape(1, D)              # [1, D], f32 bias add

    out = inverted_value_embedding(x_all, weight_t, bias_row, out_dtype=out_dtype)
    # TODO(synk): Dropout(p=0.1) omitted -- module is evaluated in inference mode.
    return out


if __name__ == "__main__":
    # Small shapes: batch=2, seq_len (c_in) L=8, variates N=4, time features M=3, d_model=32
    B, L, N, M, D = 2, 8, 4, 3, 32

    key = jax.random.PRNGKey(0)
    k_x, k_xm, k_w, k_b = jax.random.split(key, 4)

    x = jax.random.normal(k_x, (B, L, N), dtype=jnp.float32)
    x_mark = jax.random.normal(k_xm, (B, L, M), dtype=jnp.float32)

    # Deterministic nn.Linear(L, D)-style init.
    bound = 1.0 / (L ** 0.5)
    weight = jax.random.uniform(k_w, (D, L), minval=-bound, maxval=bound, dtype=jnp.float32)
    bias = jax.random.uniform(k_b, (D,), minval=-bound, maxval=bound, dtype=jnp.float32)

    out = jax.block_until_ready(data_embedding_inverted(x, x_mark, weight, bias))

    # Reference in plain JAX (same semantics as the PyTorch forward, eval mode).
    ref_in = jnp.concatenate(
        [jnp.transpose(x, (0, 2, 1)), jnp.transpose(x_mark, (0, 2, 1))], axis=1
    )
    ref = jnp.einsum("bvl,dl->bvd", ref_in, weight) + bias
    assert out.shape == (B, N + M, D), out.shape
    assert jnp.allclose(out, ref, atol=1e-5, rtol=1e-5)

    # x_mark = None path.
    out_nom = jax.block_until_ready(data_embedding_inverted(x, None, weight, bias))
    ref_nom = jnp.einsum("bvl,dl->bvd", jnp.transpose(x, (0, 2, 1)), weight) + bias
    assert out_nom.shape == (B, N, D), out_nom.shape
    assert jnp.allclose(out_nom, ref_nom, atol=1e-5, rtol=1e-5)

    # bf16 output path (halves output HBM traffic for downstream bf16 consumers).
    out_bf16 = jax.block_until_ready(
        data_embedding_inverted(x, x_mark, weight, bias, out_dtype=jnp.bfloat16)
    )
    assert out_bf16.shape == (B, N + M, D), out_bf16.shape
    assert out_bf16.dtype == jnp.bfloat16
    assert jnp.allclose(out_bf16.astype(jnp.float32), ref, atol=5e-2, rtol=5e-2)

    print("KERNEL_OK")
</pallas_src>

<mosaic_0001>
module attributes {stable_mosaic.version = 11 : i64} {
  func.func @_inverted_embed_kernel(%arg0: i32, %arg1: i32, %arg2: memref<1x8x7xf32, #tpu.memory_space<vmem>>, %arg3: memref<8x32xf32, #tpu.memory_space<vmem>>, %arg4: memref<1x32xf32, #tpu.memory_space<vmem>>, %arg5: memref<1x7x32xf32, #tpu.memory_space<vmem>>) attributes {dimension_semantics = [#tpu.dimension_semantics<parallel>, #tpu.dimension_semantics<parallel>], iteration_bounds = array<i64: 2, 1>, scalar_prefetch = 0 : i64, scratch_operands = 0 : i64, tpu.core_type = #tpu.core_type<tc>, window_params = [{transform_indices = @transform_0, window_bounds = array<i64: 1, 8, 7>}, {pipeline_mode = #tpu.pipeline_mode<synchronous>, transform_indices = @transform_1, window_bounds = array<i64: 8, 32>}, {pipeline_mode = #tpu.pipeline_mode<synchronous>, transform_indices = @transform_2, window_bounds = array<i64: 1, 32>}, {transform_indices = @transform_3, window_bounds = array<i64: 1, 7, 32>}]} {
    %c0 = arith.constant 0 : index
    %c0_0 = arith.constant 0 : index
    %0 = vector.load %arg3[%c0, %c0_0] : memref<8x32xf32, #tpu.memory_space<vmem>>, vector<8x32xf32>
    %c0_1 = arith.constant 0 : index
    %c0_2 = arith.constant 0 : index
    %1 = vector.load %arg4[%c0_1, %c0_2] : memref<1x32xf32, #tpu.memory_space<vmem>>, vector<1x32xf32>
    %c0_3 = arith.constant 0 : index
    %c0_4 = arith.constant 0 : index
    %c0_5 = arith.constant 0 : index
    %2 = vector.load %arg2[%c0_3, %c0_4, %c0_5] : memref<1x8x7xf32, #tpu.memory_space<vmem>>, vector<1x8x7xf32>
    %3 = vector.shape_cast %2 : vector<1x8x7xf32> to vector<8x7xf32>
    %cst = arith.constant dense<0.000000e+00> : vector<7x32xf32>
    %4 = tpu.matmul %3, %0, %cst {dimension_numbers = #tpu.dot_dimension_numbers<[0], [0], [1], [1], [0, 1, 1, 1], [], []>} : vector<8x7xf32>, vector<8x32xf32>, vector<7x32xf32> -> vector<7x32xf32>
    %5 = vector.broadcast %1 : vector<1x32xf32> to vector<7x32xf32>
    %6 = arith.addf %4, %5 : vector<7x32xf32>
    %c0_6 = arith.constant 0 : index
    %c0_7 = arith.constant 0 : index
    %c0_8 = arith.constant 0 : index
    %7 = vector.load %arg5[%c0_6, %c0_7, %c0_8] : memref<1x7x32xf32, #tpu.memory_space<vmem>>, vector<1x7x32xf32>
    %8 = vector.shape_cast %7 : vector<1x7x32xf32> to vector<7x32xf32>
    %9 = vector.shape_cast %6 : vector<7x32xf32> to vector<1x7x32xf32>
    tpu.vector_store %arg5[%c0_6, %c0_7, %c0_8], %9 {strides = array<i32>} : memref<1x7x32xf32, #tpu.memory_space<vmem>>, vector<1x7x32xf32>,
    return
  }
  func.func @transform_0(%arg0: i32, %arg1: i32) -> (i32, i32, i32) {
    %c0_i32 = arith.constant 0 : i32
    %c0_i32_0 = arith.constant 0 : i32
    return %arg0, %c0_i32, %arg1 : i32, i32, i32
  }
  func.func @transform_1(%arg0: i32, %arg1: i32) -> (i32, i32) {
    %c0_i32 = arith.constant 0 : i32
    %c0_i32_0 = arith.constant 0 : i32
    %c0_i32_1 = arith.constant 0 : i32
    return %c0_i32, %c0_i32_0 : i32, i32
  }
  func.func @transform_2(%arg0: i32, %arg1: i32) -> (i32, i32) {
    %c0_i32 = arith.constant 0 : i32
    %c0_i32_0 = arith.constant 0 : i32
    %c0_i32_1 = arith.constant 0 : i32
    return %c0_i32, %c0_i32_0 : i32, i32
  }
  func.func @transform_3(%arg0: i32, %arg1: i32) -> (i32, i32, i32) {
    %c0_i32 = arith.constant 0 : i32
    %c0_i32_0 = arith.constant 0 : i32
    return %arg0, %arg1, %c0_i32 : i32, i32, i32
  }
}

</mosaic_0001>

<bundles_post_ra>
// kernel: tpu_custom_call.1
= control target key start
LH: loop header
LB: loop body
LE: loop exit
PB: predicated region body
PF: predicated region fallthrough
CT: control target
= control target key end

     0   :  { %s415_s12 = smov 0   ;;  %s417_s13 = smov 0   ;;  %s447_s0 = inlined_call_operand.vmem [shape: f32[2,8,7], index: 0, kind: input, shape index: {}]   ;;  %s448_s1 = inlined_call_operand.vmem [shape: f32[8,32], index: 1, kind: input, shape index: {}]   ;;  %s449_s2 = inlined_call_operand.vmem [shape: f32[1,32], index: 2, kind: input, shape index: {}]   ;;  %s450_s3 = inlined_call_operand.vmem [shape: f32[2,7,32], index: 3, kind: output, shape index: {}]  }
   0x1   :  { %s419_s14 = smov 0  }
   0x2 LB: > { %s25_s15 = sadd.s32 1, %s389_s13  ;;  %p339_p0 = scmp.ge.s32.totalorder %s393_s14, 1  ;;  %s393_s14 = sphi %s419_s14, %s13_s14   ;;  %s389_s13 = sphi %s417_s13, %s452_s13   ;;  %s385_s12 = sphi %s415_s12, %s451_s12  }
   0x3   : > { %p27_p1 = scmp.ge.s32.totalorder %s25_s15, 2  ;;  %p155_p2 = scmp.lt.s32.totalorder %s393_s14, 3 }
   0x5   : > { %s454_s15 = smov (%p27_p1, %s25_s15), 0  ;;  %p156_p3 = pnand %p339_p0, %p155_p2 }
   0x6   : > { %p183_p4 = scmp.lt.s32.totalorder (!%p156_p3), %s385_s12, 1 }
   0x7   : > { %159 = sbr.rel (%p156_p3) target bundleno = 310 (0x136), region = 32 }
   0xc   : > { %v197_v0 = vld [vmem:[%s448_s1] sm:$0xff]  ;;  %s456_s12 = smov (!%p183_p4, %s385_s12), 1  ;;  %vm235_vm0 = vcmask 64512   ;;  %vm259_vm1 = vcmask 260096  }
   0xd   : > { %254 = vmatpush.msra.mxu0 %v197_v0  ;;  %s340_s18 = sshll.u32 %s456_s12, 3  ;;  %v370_v3 = vld [vmem:[%s449_s2] ss:$0 sm:$0xff] }
   0xe   : > { %s189_s21 = scalar_lea.vmem %s447_s0, %s340_s18  ;;  %s196_s26 = scalar_lea.vmem %s450_s3, %s340_s18 }
   0xf   : > { %v199_v1 = vld [vmem:[%s189_s21] sm:$0xff] }
  0x10   : > { %203 = vxpose.xlu0.b32.start.end [1/1] (short) (narrow) %v199_v1, 8 }
  0xb4   : > { %v219_v2 = vpop.trf.xlu0 }
  0xb5   : > { %342 = vmatmul.msk.f32.vlgmr.msra.gmra.mxu0 %vm235_vm0, %v219_v2 }
 0x132   : > { %v256_v4 = vpop.f32.mrf.mxu0 }
 0x133   : > { %v257_v5 = vadd.f32 %v370_v3, %v256_v4 }
 0x135   : > { %260 = vst.msk [vmem:[%s196_s26] sm:$0x7f] %vm259_vm1, %v257_v5 }
 0x136 PF: > { %s13_s14 = sadd.s32 1, %s393_s14   ;;  %s451_s12 = smov %s389_s13 }
 0x137   : > { %p10_p5 = scmp.ge.s32.totalorder %s13_s14, 4   ;;  %s452_s13 = smov %s454_s15 }
 0x139   :  { %12 = sbr.rel (!%p10_p5) target bundleno = 2 (0x2), region = 62 }

</bundles_post_ra>
